<compile_context>
chip_gen: v7x
topology: tpu7x:2x2x1
jax: 0.10.0
libtpu: 0.0.40
codegen_flags: <defaults>
</compile_context>

<pallas_src>
import math
import functools
import jax
import jax.numpy as jnp
from jax.experimental import pallas as pl
from jax.experimental.pallas import tpu as pltpu


def _vmem_limit_bytes(*block_bytes):
    # 2x for double buffering + headroom; clamp to [16 MiB, 64 MiB] so the
    # value is legal on every generation (v7x physical VMEM = 64 MiB).
    total = 2 * sum(int(b) for b in block_bytes) + (4 << 20)
    return int(min(max(total, 16 << 20), 64 << 20))


def _largest_divisor_fitting(total, per_item_bytes, budget_bytes):
    """Largest divisor g of `total` with g * per_item_bytes <= budget."""
    best = 1
    for cand in range(1, total + 1):
        if total % cand == 0 and cand * per_item_bytes <= budget_bytes:
            best = cand
    return best


# ----------------------- row-tiled linear (matmul + bias) ---------------------

def _linear_kernel(x_ref, w_ref, b_ref, o_ref):
    # x_ref: (TM, K), w_ref: (K, Nout), b_ref: (1, Nout), o_ref: (TM, Nout)
    acc = jnp.dot(x_ref[...], w_ref[...], preferred_element_type=jnp.float32)
    acc = acc + b_ref[...].astype(jnp.float32)
    o_ref[...] = acc.astype(o_ref.dtype)


def linear_pallas(x2, w, b=None, *, tile_m=256):
    """x2: (M, K), w: (K, Nout), b: (Nout,) or None. Returns (M, Nout)."""
    M, K = x2.shape
    Nout = w.shape[1]
    if b is None:
        b = jnp.zeros((Nout,), dtype=x2.dtype)

    # Fixed row tile (multiple of 8 sublanes / MXU friendly); never larger than M.
    tile_m = min(tile_m, M)
    grid = (pl.cdiv(M, tile_m),)

    isz = jnp.dtype(x2.dtype).itemsize
    vmem_limit = _vmem_limit_bytes(
        tile_m * K * isz,          # x tile
        K * Nout * isz,            # resident weight
        Nout * isz,                # bias
        tile_m * Nout * isz,       # out tile
        tile_m * Nout * 4,         # f32 accumulator
    )

    out = pl.pallas_call(
        _linear_kernel,
        out_shape=jax.ShapeDtypeStruct((M, Nout), x2.dtype),
        grid_spec=pltpu.PrefetchScalarGridSpec(
            num_scalar_prefetch=0,
            grid=grid,
            in_specs=[
                pl.BlockSpec((tile_m, K), lambda i: (i, 0)),   # x row tile
                pl.BlockSpec((K, Nout), lambda i: (0, 0)),     # W (resident)
                pl.BlockSpec((1, Nout), lambda i: (0, 0)),     # bias (resident)
            ],
            out_specs=pl.BlockSpec((tile_m, Nout), lambda i: (i, 0)),
        ),
        compiler_params=pltpu.CompilerParams(
            dimension_semantics=("parallel",),
            vmem_limit_bytes=vmem_limit),
    )(x2, w, b.reshape(1, Nout))
    return out


# --------------------------- grouped attention core ---------------------------

def _attn_core_kernel(q_ref, k_ref, v_ref, ctx_ref, attn_ref, *, scale):
    # q_ref/k_ref/v_ref/ctx_ref: (GH, N, D); attn_ref: (GH, N, N)
    q = q_ref[...]                               # input dtype (MXU operand)
    k = k_ref[...]
    v = v_ref[...]

    # scores = q @ k^T * scale   (batched over the GH heads, f32 accumulation)
    s = jnp.einsum('bqd,bkd->bqk', q, k, preferred_element_type=jnp.float32)
    s = s * jnp.float32(scale)

    # numerically stable softmax over keys, in f32 (matches torch .softmax(-1))
    m = jnp.max(s, axis=-1, keepdims=True)
    p = jnp.exp(s - m)
    p = p / jnp.sum(p, axis=-1, keepdims=True)

    attn_ref[...] = p.astype(attn_ref.dtype)

    # ctx = attn @ v (MXU operands in v's dtype, accumulate f32)
    ctx = jnp.einsum('bqk,bkd->bqd', p.astype(v.dtype), v,
                     preferred_element_type=jnp.float32)
    ctx_ref[...] = ctx.astype(ctx_ref.dtype)


def attention_pallas(x, w_qkv, b_qkv, w_proj, b_proj, *, num_heads, qk_scale=None):
    """x: (B, N, C). Returns (out (B,N,C), attn (B,H,N,N))."""
    B, N, C = x.shape
    H = num_heads
    D = C // H
    BH = B * H
    scale = qk_scale if qk_scale is not None else D ** (-0.5)

    # 1) fused qkv projection (row-tiled matmul)
    x2 = x.reshape(B * N, C)
    qkv = linear_pallas(x2, w_qkv, b_qkv)                          # (B*N, 3C)

    # layout plumbing (outside the kernel): -> (3, B*H, N, D)
    qkv = qkv.reshape(B, N, 3, H, D).transpose(2, 0, 3, 1, 4)      # (3, B, H, N, D)
    qkv = qkv.reshape(3, BH, N, D)
    q, k, v = qkv[0], qkv[1], qkv[2]

    # 2) grouped (batch, head) attention core.  Pack GH heads per grid step to
    #    amortize per-step overhead while keeping the working set in VMEM.
    isz = jnp.dtype(x.dtype).itemsize
    per_head_bytes = (4 * N * D * isz        # q, k, v, ctx blocks
                      + N * N * isz          # attn block
                      + 2 * N * N * 4)       # f32 scores / probs
    GH = _largest_divisor_fitting(BH, per_head_bytes, budget_bytes=8 << 20)

    vmem_limit = _vmem_limit_bytes(GH * per_head_bytes)

    kernel = functools.partial(_attn_core_kernel, scale=scale)
    ctx, attn = pl.pallas_call(
        kernel,
        out_shape=(jax.ShapeDtypeStruct((BH, N, D), x.dtype),
                   jax.ShapeDtypeStruct((BH, N, N), x.dtype)),
        grid_spec=pltpu.PrefetchScalarGridSpec(
            num_scalar_prefetch=0,
            grid=(BH // GH,),
            in_specs=[
                pl.BlockSpec((GH, N, D), lambda i: (i, 0, 0)),   # q
                pl.BlockSpec((GH, N, D), lambda i: (i, 0, 0)),   # k
                pl.BlockSpec((GH, N, D), lambda i: (i, 0, 0)),   # v
            ],
            out_specs=[
                pl.BlockSpec((GH, N, D), lambda i: (i, 0, 0)),   # ctx
                pl.BlockSpec((GH, N, N), lambda i: (i, 0, 0)),   # attn
            ],
        ),
        compiler_params=pltpu.CompilerParams(
            dimension_semantics=("parallel",),
            vmem_limit_bytes=vmem_limit),
    )(q, k, v)

    # 3) merge heads + output projection
    ctx = ctx.reshape(B, H, N, D).transpose(0, 2, 1, 3).reshape(B * N, C)
    out = linear_pallas(ctx, w_proj, b_proj)                       # (B*N, C)

    # TODO(synk): attn_drop / proj_drop are identity at p=0.0 and are omitted.
    return out.reshape(B, N, C), attn.reshape(B, H, N, N)


# --------------------------------- reference ----------------------------------

def attention_reference(x, w_qkv, b_qkv, w_proj, b_proj, num_heads, qk_scale=None):
    B, N, C = x.shape
    H = num_heads
    D = C // H
    scale = qk_scale if qk_scale is not None else D ** (-0.5)

    qkv = jnp.dot(x, w_qkv)
    if b_qkv is not None:
        qkv = qkv + b_qkv
    qkv = qkv.reshape(B, N, 3, H, D).transpose(2, 0, 3, 1, 4)
    q, k, v = qkv[0], qkv[1], qkv[2]

    attn = jnp.einsum('bhnd,bhmd->bhnm', q, k) * scale
    attn = jax.nn.softmax(attn, axis=-1)
    ctx = jnp.einsum('bhnm,bhmd->bhnd', attn, v)
    out = ctx.transpose(0, 2, 1, 3).reshape(B, N, C)
    out = jnp.dot(out, w_proj) + b_proj
    return out, attn


def init_attention_params(key, dim, dtype=jnp.float32):
    """nn.Linear-style uniform init; weights stored (in, out) for row-major matmul."""
    k1, k2, k3 = jax.random.split(key, 3)
    bound = 1.0 / math.sqrt(dim)
    w_qkv = jax.random.uniform(k1, (dim, 3 * dim), dtype, minval=-bound, maxval=bound)
    w_proj = jax.random.uniform(k2, (dim, dim), dtype, minval=-bound, maxval=bound)
    b_proj = jax.random.uniform(k3, (dim,), dtype, minval=-bound, maxval=bound)
    return w_qkv, None, w_proj, b_proj   # qkv_bias=False (module default)


if __name__ == "__main__":
    key = jax.random.PRNGKey(0)
    kx, kp = jax.random.split(key)

    # small ViT-like shapes: batch=2, tokens=8, dim=32, heads=4 (head_dim=8)
    B, N, C, H = 2, 8, 32, 4
    x = jax.random.normal(kx, (B, N, C), dtype=jnp.float32)
    w_qkv, b_qkv, w_proj, b_proj = init_attention_params(kp, C)

    y, attn = attention_pallas(x, w_qkv, b_qkv, w_proj, b_proj, num_heads=H)
    y = jax.block_until_ready(y)
    attn = jax.block_until_ready(attn)

    y_ref, attn_ref = attention_reference(x, w_qkv, b_qkv, w_proj, b_proj, num_heads=H)
    assert y.shape == (B, N, C), y.shape
    assert attn.shape == (B, H, N, N), attn.shape
    assert jnp.allclose(y, y_ref, atol=1e-5, rtol=1e-4), "output mismatch vs reference"
    assert jnp.allclose(attn, attn_ref, atol=1e-5, rtol=1e-4), "attn mismatch vs reference"

    print("KERNEL_OK")
</pallas_src>

<mosaic_0001>
module attributes {stable_mosaic.version = 11 : i64} {
  func.func @_linear_kernel(%arg0: i32, %arg1: memref<16x32xf32, #tpu.memory_space<vmem>>, %arg2: memref<32x96xf32, #tpu.memory_space<vmem>>, %arg3: memref<1x96xf32, #tpu.memory_space<vmem>>, %arg4: memref<16x96xf32, #tpu.memory_space<vmem>>) attributes {dimension_semantics = [#tpu.dimension_semantics<parallel>], iteration_bounds = array<i64: 1>, scalar_prefetch = 0 : i64, scratch_operands = 0 : i64, tpu.core_type = #tpu.core_type<tc>, window_params = [{transform_indices = @transform_0, window_bounds = array<i64: 16, 32>}, {pipeline_mode = #tpu.pipeline_mode<synchronous>, transform_indices = @transform_1, window_bounds = array<i64: 32, 96>}, {pipeline_mode = #tpu.pipeline_mode<synchronous>, transform_indices = @transform_2, window_bounds = array<i64: 1, 96>}, {transform_indices = @transform_3, window_bounds = array<i64: 16, 96>}]} {
    %c0 = arith.constant 0 : index
    %c0_0 = arith.constant 0 : index
    %0 = vector.load %arg1[%c0, %c0_0] : memref<16x32xf32, #tpu.memory_space<vmem>>, vector<16x32xf32>
    %c0_1 = arith.constant 0 : index
    %c0_2 = arith.constant 0 : index
    %1 = vector.load %arg2[%c0_1, %c0_2] : memref<32x96xf32, #tpu.memory_space<vmem>>, vector<32x96xf32>
    %cst = arith.constant dense<0.000000e+00> : vector<16x96xf32>
    %2 = tpu.matmul %0, %1, %cst {dimension_numbers = #tpu.dot_dimension_numbers<[1], [0], [0], [1], [0, 0, 1, 1], [], []>} : vector<16x32xf32>, vector<32x96xf32>, vector<16x96xf32> -> vector<16x96xf32>
    %c0_3 = arith.constant 0 : index
    %c0_4 = arith.constant 0 : index
    %3 = vector.load %arg3[%c0_3, %c0_4] : memref<1x96xf32, #tpu.memory_space<vmem>>, vector<1x96xf32>
    %4 = vector.broadcast %3 : vector<1x96xf32> to vector<16x96xf32>
    %5 = arith.addf %2, %4 : vector<16x96xf32>
    %c0_5 = arith.constant 0 : index
    %c0_6 = arith.constant 0 : index
    %6 = vector.load %arg4[%c0_5, %c0_6] : memref<16x96xf32, #tpu.memory_space<vmem>>, vector<16x96xf32>
    tpu.vector_store %arg4[%c0_5, %c0_6], %5 {strides = array<i32>} : memref<16x96xf32, #tpu.memory_space<vmem>>, vector<16x96xf32>,
    return
  }
  func.func @transform_0(%arg0: i32) -> (i32, i32) {
    %c0_i32 = arith.constant 0 : i32
    %c0_i32_0 = arith.constant 0 : i32
    return %arg0, %c0_i32 : i32, i32
  }
  func.func @transform_1(%arg0: i32) -> (i32, i32) {
    %c0_i32 = arith.constant 0 : i32
    %c0_i32_0 = arith.constant 0 : i32
    %c0_i32_1 = arith.constant 0 : i32
    return %c0_i32, %c0_i32_0 : i32, i32
  }
  func.func @transform_2(%arg0: i32) -> (i32, i32) {
    %c0_i32 = arith.constant 0 : i32
    %c0_i32_0 = arith.constant 0 : i32
    %c0_i32_1 = arith.constant 0 : i32
    return %c0_i32, %c0_i32_0 : i32, i32
  }
  func.func @transform_3(%arg0: i32) -> (i32, i32) {
    %c0_i32 = arith.constant 0 : i32
    %c0_i32_0 = arith.constant 0 : i32
    return %arg0, %c0_i32 : i32, i32
  }
}

</mosaic_0001>

<bundles_post_ra>
// kernel: tpu_custom_call.1
= control target key start
LH: loop header
LB: loop body
LE: loop exit
PB: predicated region body
PF: predicated region fallthrough
CT: control target
= control target key end

     0   :  { %8 = vsyncpa [#allocation3], 0  ;;  %s337_s0 = inlined_call_operand.hbm [shape: f32[16,32], index: 0, kind: input, shape index: {}]   ;;  %s338_s1 = inlined_call_operand.hbm [shape: f32[32,96], index: 1, kind: input, shape index: {}]   ;;  %s339_s2 = inlined_call_operand.vmem [shape: f32[1,96], index: 2, kind: input, shape index: {}]   ;;  %s340_s3 = inlined_call_operand.hbm [shape: f32[16,96], index: 3, kind: output, shape index: {}]  }
   0x1   :  { %9 = vsyncpa [#allocation6], 0 }
   0x2   :  { %10 = vsyncpa [#allocation4], 0  ;;  %s264_s12 = smov [#allocation2]   ;;  %s192_s16 = scalar_lea.hbm %s337_s0, 256 }
   0x3   :  { %s16_s13 = sshll.u32 %s264_s12, 4  ;;  %p193_p0 = scmp.ne.s32.totalorder %s337_s0, %s192_s16  ;;  %s17_s13 = int_to_ptr.vmem [resolvable:$true] %s16_s13 }
   0x4   :  { %p196_p1 = scmp.lt.u32.totalorder %s192_s16, %s337_s0 }
   0x6   :  { %p198_p2 = pnand %p196_p1, %p193_p0 }
   0x8   :  { %201 = shalt.err (!%p198_p2)
}
   0x9   :  { %s202_s21 = scalar_lea.vmem %s17_s13, 256  ;;  %p207_p4 = scmp.lt.s32.totalorder %s17_s13, %s17_s13 }
   0xa   :  { %p203_p3 = scmp.ne.s32.totalorder %s17_s13, %s202_s21  ;;  %p208_p5 = scmp.lt.s32.totalorder %s202_s21, %s202_s21 }
   0xc   :  { %p209_p6 = por %p208_p5, %p207_p4 }
   0xe   :  { %p210_p7 = pnand %p209_p6, %p203_p3 }
  0x10   :  { %213 = shalt.err (!%p210_p7)
}
  0x11   :  { %s265_s22 = smov 128   ;;  %s266_s23 = smov 8  }
  0x12   :  { %22 = dma.hbm_to_vmem [thread:$0]  %s337_s0, 256, %s17_s13, [#allocation3], %s265_s22, %s265_s22, %s266_s23  }
  0x13   :  { %s267_s26 = smov [#allocation5]   ;;  %s214_s30 = scalar_lea.hbm %s338_s1, 512 }
  0x14   :  { %s28_s27 = sshll.u32 %s267_s26, 4  ;;  %p215_p8 = scmp.ne.s32.totalorder %s338_s1, %s214_s30  ;;  %s29_s27 = int_to_ptr.vmem [resolvable:$true] %s28_s27 }
  0x15   :  { %p218_p9 = scmp.lt.u32.totalorder %s214_s30, %s338_s1 }
  0x17   :  { %p220_p10 = pnand %p218_p9, %p215_p8 }
  0x19   :  { %223 = shalt.err (!%p220_p10)
}
  0x1a   :  { %s224_s8 = scalar_lea.vmem %s29_s27, 512  ;;  %p229_p12 = scmp.lt.s32.totalorder %s29_s27, %s29_s27 }
  0x1b   :  { %p225_p11 = scmp.ne.s32.totalorder %s29_s27, %s224_s8  ;;  %p230_p13 = scmp.lt.s32.totalorder %s224_s8, %s224_s8 }
  0x1d   :  { %p231_p0 = por %p230_p13, %p229_p12 }
  0x1f   :  { %p232_p1 = pnand %p231_p0, %p225_p11 }
  0x21   :  { %235 = shalt.err (!%p232_p1)
}
  0x22   :  { %34 = dma.hbm_to_vmem [thread:$0]  %s338_s1, 512, %s29_s27, [#allocation6], %s265_s22, %s265_s22, %s266_s23  }
  0x23   :  { %258 = dma.done.wait [#allocation3], 256  }
  0x24   :  { %259 = vsyncadd [#allocation3], 4294967040 }
  0x25   :  { %260 = dma.done.wait [#allocation6], 512  }
  0x26   :  { %261 = vsyncadd [#allocation6], 4294966784  ;;  %vm56_vm0 = vcmask 261120   ;;  %v45_v0 = vld [vmem:[#allocation5] sm:$0xff]  ;;  %v46_v1 = vld [vmem:[#allocation5 + $0x8] sm:$0xff]  ;;  %s268_s11 = smov [#allocation7]  }
  0x27   :  { %v47_v2 = vld [vmem:[#allocation5 + $0x10] sm:$0xff]  ;;  %v179_v3 = vpack.c.bf16 %v46_v1, %v45_v0  ;;  %v48_v4 = vld [vmem:[#allocation5 + $0x18] sm:$0xff]  ;;  %s146_s12 = sshll.u32 %s268_s11, 4  ;;  %vm138_vm1 = vcmask 785408   ;;  %s147_s12 = int_to_ptr.vmem [resolvable:$true] %s146_s12 }
  0x28   :  { %v43_v5 = vld [vmem:[#allocation2] sm:$0xff]  ;;  %v183_v6 = vpack.c.bf16 %v48_v4, %v47_v2  ;;  %v44_v7 = vld [vmem:[#allocation2 + $0x8] sm:$0xff]  ;;  %s236_s13 = scalar_lea.vmem %s147_s12, 256  ;;  %p241_p3 = scmp.lt.s32.totalorder %s147_s12, %s147_s12 }
  0x29   :  { %176 = vmatprep.mubr.msk.f32.mxu0 %vm56_vm0, %v43_v5  ;;  %180 = vmatprep.subr.bf16.mxu0 %v179_v3  ;;  %v159_v8 = vld [vmem:[%s339_s2] ss:$0 sm:$0xff]  ;;  %p237_p2 = scmp.ne.s32.totalorder %s147_s12, %s236_s13  ;;  %p242_p4 = scmp.lt.s32.totalorder %s236_s13, %s236_s13 }
  0x2a   :  { %182 = vmatpush3.bf16.msra.mxu0 %v179_v3 }
  0x2b   :  { %184 = vmatprep.subr.bf16.mxu0 %v183_v6  ;;  %p243_p5 = por %p242_p4, %p241_p3 }
  0x2d   :  { %p244_p6 = pnand %p243_p5, %p237_p2 }
  0x2e   :  { %186 = vmatpush3.bf16.msra.mxu0 %v183_v6 }
  0x31   :  { %177 = vmatmul.mubr.msk.f32.vlgmr.msra.gmra.mrb[0].mxu0 %vm56_vm0, %v44_v7 }
 0x104   :  { %v178_v9 = vpop.f32.mrb[0].mxu0 }
 0x105   :  { %v135_v10 = vadd.f32 %v178_v9, %v159_v8  ;;  %v129_v11 = vpop.f32.mrb[1].mxu0 }
 0x106   :  { %v130_v12 = vadd.f32 %v159_v8, %v129_v11 }
 0x107   :  { %140 = vst.msk [vmem:[#allocation7 + $0x8] sm:$0xff] %vm138_vm1, %v135_v10 }
 0x108   :  { %139 = vst.msk [vmem:[#allocation7] sm:$0xff] %vm138_vm1, %v130_v12 }
 0x109   :  { %247 = shalt.err (!%p244_p6)
}
 0x10a   :  { %s248_s2 = scalar_lea.hbm %s340_s3, 256 }
 0x10b   :  { %p249_p7 = scmp.ne.s32.totalorder %s340_s3, %s248_s2  ;;  %p252_p8 = scmp.lt.u32.totalorder %s248_s2, %s340_s3 }
 0x10d   :  { %p254_p9 = pnand %p252_p8, %p249_p7 }
 0x10f   :  { %257 = shalt.err (!%p254_p9)
}
 0x110   :  { %152 = dma.vmem_to_hbm [thread:$0]  %s147_s12, 256, %s340_s3, [#allocation4], %s265_s22, %s265_s22, %s266_s23  }
 0x111   :  { %262 = dma.done.wait [#allocation4], 256  }
 0x112   :  { %263 = vsyncadd [#allocation4], 4294967040 }
 0x113   :  { %156 = vsyncpa [#allocation3], 1 }
 0x114   :  { %157 = vsyncpa [#allocation6], 1 }
 0x115   :  { %158 = vsyncpa [#allocation4], 1 }

</bundles_post_ra>
